<compile_context>
chip_gen: v7x
topology: tpu7x:2x2x1
jax: 0.10.0
libtpu: 0.0.40
codegen_flags: <defaults>
</compile_context>

<pallas_src>
import functools

import jax
import jax.numpy as jnp
from jax.experimental import pallas as pl
from jax.experimental.pallas import tpu as pltpu


_NEG_BIG = -1e30


def _round_up(x, m):
    return (x + m - 1) // m * m


def warp_loss_kernel(x_ref, lab_ref, xx_ref, prox_ref, yy_ref, loss_ref, ce_acc,
                     *, k1, k2, alpha, temp, margin, loss_norm,
                     batch_real, batch_pad, classes_real):
    """Processes one (tb, D) batch tile; CE accumulated in VMEM, reduced once per partial."""
    part = pl.program_id(0)          # partial / megacore axis ("parallel")
    step = pl.program_id(1)          # batch-tile axis ("arbitrary")
    n_steps = pl.num_programs(1)

    tb = x_ref.shape[0]
    c_pad = prox_ref.shape[1]

    @pl.when(step == 0)
    def _():
        ce_acc[...] = jnp.zeros_like(ce_acc)

    # ---- euclidean distances: sqrt(clamp(|x|^2 + |p|^2 - 2 x.p, 1e-12)) ----
    # xx / yy are precomputed in f32 in the wrapper; x.p runs on the MXU
    # (bf16 optional) with an f32 result.
    xp = jnp.dot(x_ref[...], prox_ref[...],
                 preferred_element_type=jnp.float32)                      # (tb, C)
    dist = jnp.sqrt(jnp.maximum(xx_ref[...] + yy_ref[...] - 2.0 * xp, 1e-12))

    # ---- one-hot mask from int labels: (1, C) iota vs (tb, 1) labels ----
    cls = jax.lax.broadcasted_iota(jnp.int32, (1, c_pad), 1)
    hot = cls == lab_ref[...]                                             # (tb, C)

    # ---- warp transform, fused via the one-hot structure ----
    #   k1_warp    = dist + (k1-1)(1-margin)*hot*dist
    #   k2_warp    = dist + hot*((k2-1)*dist + alpha*(1-k2))
    #   final_warp = temp*(dist + hot*adjust); adjust is a per-row scalar.
    # NOTE: assumes exactly one in-range label (0 <= label < C) per row, as the
    # PyTorch one_hot reference does.
    hot_dist = jnp.sum(jnp.where(hot, dist, 0.0), axis=1, keepdims=True)  # (tb, 1)
    warp_mask = (hot_dist < alpha).astype(jnp.float32)
    c1 = (k1 - 1.0) * (1.0 - margin)
    adjust = (warp_mask * (c1 * hot_dist)
              + (1.0 - warp_mask) * ((k2 - 1.0) * hot_dist + alpha * (1.0 - k2)))
    final_warp = temp * (dist + jnp.where(hot, adjust, 0.0))              # (tb, C)

    # ---- CE = max(-hot*log_softmax(-final_warp)) = final_warp[label] + lse ----
    # (valid because log-probs <= 0 and exactly one hot per row).
    logits = -final_warp
    if c_pad != classes_real:                 # keep padded classes out of the lse
        logits = jnp.where(cls < classes_real, logits, _NEG_BIG)
    m = jnp.max(logits, axis=1, keepdims=True)
    lse = jnp.log(jnp.sum(jnp.exp(logits - m), axis=1, keepdims=True)) + m
    ce = temp * (hot_dist + adjust) + lse                                  # (tb, 1)

    if batch_pad != batch_real:               # mask padded batch rows
        row0 = (part * n_steps + step) * tb
        rows = row0 + jax.lax.broadcasted_iota(jnp.int32, (tb, 1), 0)
        ce = jnp.where(rows < batch_real, ce, 0.0)

    ce_acc[...] += ce                          # no per-step cross-lane reduce

    @pl.when(step == n_steps - 1)
    def _():
        total = jnp.sum(ce_acc[...]) * (loss_norm / batch_real)
        loss_ref[...] = jnp.broadcast_to(total, loss_ref.shape)


def warp_loss(output, labels, proxies, *, k1, k2, alpha, temp, margin,
              loss_norm, tb=128, num_partials=1, matmul_dtype=jnp.float32):
    """Pallas implementation of WarpLoss.forward (Warp=True path)."""
    B, D = output.shape
    C, D2 = proxies.shape
    assert D2 == D
    num_partials = max(1, int(num_partials))

    tb = max(8, _round_up(tb, 8))
    d_pad = _round_up(D, 128)
    c_pad = _round_up(C, 128)
    b_pad = _round_up(B, tb * num_partials)
    steps = b_pad // (tb * num_partials)

    out_f32 = output.astype(jnp.float32)
    prox_f32 = proxies.astype(jnp.float32)

    # Streamed embeddings stored in matmul_dtype (bf16 halves HBM traffic);
    # skip the zero-pad copy when shapes are already tile multiples.
    if (B, D) == (b_pad, d_pad):
        x_p = output.astype(matmul_dtype)
    else:
        x_p = jnp.zeros((b_pad, d_pad), matmul_dtype).at[:B, :D].set(
            output.astype(matmul_dtype))

    if B == b_pad:
        lab_p = labels.astype(jnp.int32).reshape(b_pad, 1)
    else:
        lab_p = jnp.zeros((b_pad, 1), jnp.int32).at[:B, 0].set(
            labels.astype(jnp.int32))

    # |x|^2 in f32 from the original embeddings (keeps the bf16 path accurate
    # and removes a per-step D-length reduction from the kernel).
    xx = jnp.sum(out_f32 * out_f32, axis=1, keepdims=True)
    if B != b_pad:
        xx = jnp.zeros((b_pad, 1), jnp.float32).at[:B].set(xx)

    # Proxies pre-transposed to (D, C): MXU-friendly contraction, VMEM-resident.
    if (C, D) == (c_pad, d_pad):
        prox_t = proxies.astype(matmul_dtype).T
    else:
        prox_t = jnp.zeros((d_pad, c_pad), matmul_dtype).at[:D, :C].set(
            proxies.astype(matmul_dtype).T)

    # |proxy|^2 in f32 from the original proxies.
    yy = jnp.sum(prox_f32 * prox_f32, axis=1)
    if C == c_pad:
        yy_p = yy.reshape(1, c_pad)
    else:
        yy_p = jnp.zeros((1, c_pad), jnp.float32).at[0, :C].set(yy)

    kernel = functools.partial(
        warp_loss_kernel, k1=float(k1), k2=float(k2), alpha=float(alpha),
        temp=float(temp), margin=float(margin), loss_norm=float(loss_norm),
        batch_real=B, batch_pad=b_pad, classes_real=C)

    # VMEM budget: single-buffered resident proxies/|p|^2, double-buffered
    # streamed tiles, output blocks, ce scratch, plus (tb, C) temporaries.
    itemsize = jnp.dtype(matmul_dtype).itemsize
    est = (d_pad * c_pad * itemsize            # resident proxies (Buffered(1))
           + 8 * c_pad * 4                     # |proxy|^2 row (8-sublane pad)
           + 2 * tb * d_pad * itemsize         # double-buffered embedding tiles
           + 2 * 2 * tb * 128 * 4              # double-buffered labels + |x|^2 (lane pad)
           + 2 * num_partials * 8 * 128 * 4    # output blocks
           + tb * 128 * 4                      # ce accumulator scratch
           + 8 * tb * c_pad * 4)               # headroom for (tb, C) temporaries
    try:
        vmem_cap = int(pltpu.get_tpu_info().vmem_capacity_bytes)
    except Exception:
        vmem_cap = 64 * 2**20                  # conservative (v7x per-core VMEM)
    vmem_limit = int(min(max(32 * 2**20, (est * 3) // 2), vmem_cap - 4 * 2**20))
    vmem_limit = max(vmem_limit, 16 * 2**20)

    row_block = lambda p, i: (p * steps + i, 0)
    const_block = lambda p, i: (0, 0)

    def _resident_spec(shape):
        # Constant index_map -> a second pipeline buffer is pure VMEM waste.
        if hasattr(pl, "Buffered"):
            try:
                return pl.BlockSpec(shape, const_block,
                                    pipeline_mode=pl.Buffered(1))
            except TypeError:
                pass
        return pl.BlockSpec(shape, const_block)

    out = pl.pallas_call(
        kernel,
        out_shape=jax.ShapeDtypeStruct((num_partials * 8, 128), jnp.float32),
        grid_spec=pltpu.PrefetchScalarGridSpec(
            num_scalar_prefetch=0,
            grid=(num_partials, steps),
            in_specs=[
                pl.BlockSpec((tb, d_pad), row_block),     # embeddings (stream)
                pl.BlockSpec((tb, 1), row_block),         # int32 labels (stream)
                pl.BlockSpec((tb, 1), row_block),         # |x|^2 f32 (stream)
                _resident_spec((d_pad, c_pad)),           # proxies^T (resident)
                _resident_spec((1, c_pad)),               # |proxy|^2 (resident)
            ],
            out_specs=pl.BlockSpec((8, 128), lambda p, i: (p, 0)),
            scratch_shapes=[pltpu.VMEM((tb, 1), jnp.float32)],   # ce accumulator
        ),
        compiler_params=pltpu.CompilerParams(
            dimension_semantics=("parallel", "arbitrary"),
            vmem_limit_bytes=vmem_limit),
    )(x_p, lab_p, xx, prox_t, yy_p)
    # Each partial's scalar is replicated across its (8, 128) block.
    return jnp.sum(out[0::8, 0])


def warp_loss_ref(output, labels, proxies, *, k1, k2, alpha, temp, margin,
                  loss_norm):
    """Pure-JAX reference (mirrors the PyTorch forward, Warp=True)."""
    C = proxies.shape[0]
    hot = jax.nn.one_hot(labels, C, dtype=jnp.float32)
    xx = jnp.sum(output ** 2, axis=1, keepdims=True)
    yy = jnp.sum(proxies ** 2, axis=1)[None, :]
    xy = jnp.dot(output, proxies.T, precision=jax.lax.Precision.HIGHEST)
    dist = jnp.sqrt(jnp.maximum(xx + yy - 2.0 * xy, 1e-12))
    hot_dist = jnp.max(hot * dist, axis=1, keepdims=True)
    warp_mask = (hot_dist < alpha).astype(jnp.float32)
    cold = 1.0 - hot
    no_match = k1 * hot * dist + cold * dist
    k1_warp = no_match + margin * (dist - no_match)
    k2_warp = hot * (k2 * dist + alpha * (1.0 - k2)) + cold * dist
    final_warp = temp * warp_mask * k1_warp + temp * (1.0 - warp_mask) * k2_warp
    log_probs = jax.nn.log_softmax(-final_warp, axis=1)
    ce = jnp.max(-hot * log_probs, axis=1)
    return loss_norm * jnp.mean(ce)


if __name__ == "__main__":
    # Small shapes consistent with the module: Output [B, D], Labels [B],
    # Proxies [num_classes, D].
    B, D, C = 16, 128, 16
    # cfg-style hyperparameters. alpha chosen so the two batch halves land on
    # opposite sides of the warp_mask threshold with a wide margin.
    cfg = dict(k1=0.1, k2=2.0, alpha=18.0, temp=16.0, margin=0.7, loss_norm=1.0)

    key = jax.random.PRNGKey(0)
    k_out, k_prox, k_lab = jax.random.split(key, 3)

    output = jax.random.normal(k_out, (B, D), dtype=jnp.float32)
    output = output.at[B // 2:].multiply(2.0)   # second half: hot_dist > alpha
    labels = jax.random.randint(k_lab, (B,), 0, C, dtype=jnp.int32)
    # Deterministic kaiming_normal_(mode='fan_out') init: std = sqrt(2 / C).
    proxies = jax.random.normal(k_prox, (C, D), dtype=jnp.float32) * jnp.sqrt(2.0 / C)

    ref = warp_loss_ref(output, labels, proxies, **cfg)

    # f32 MXU path (single-TC defaults).
    loss_f32 = jax.block_until_ready(warp_loss(output, labels, proxies, **cfg))
    assert jnp.allclose(loss_f32, ref, rtol=2e-2, atol=5e-2), (loss_f32, ref)

    # bf16 streamed-x path + 2 partials (v7x megacore config): looser tolerance,
    # f32 xx/yy and f32 accumulation keep the error bounded by the bf16 matmul.
    loss_bf16 = jax.block_until_ready(
        warp_loss(output, labels, proxies, matmul_dtype=jnp.bfloat16,
                  num_partials=2, **cfg))
    assert jnp.allclose(loss_bf16, ref, rtol=1e-1, atol=1.0), (loss_bf16, ref)

    print("KERNEL_OK")
</pallas_src>

<mosaic_0001>
module attributes {stable_mosaic.version = 11 : i64} {
  func.func @warp_loss_kernel(%arg0: i32, %arg1: i32, %arg2: memref<128x128xf32, #tpu.memory_space<vmem>>, %arg3: memref<128x1xi32, #tpu.memory_space<vmem>>, %arg4: memref<128x1xf32, #tpu.memory_space<vmem>>, %arg5: memref<128x128xf32, #tpu.memory_space<vmem>>, %arg6: memref<1x128xf32, #tpu.memory_space<vmem>>, %arg7: memref<8x128xf32, #tpu.memory_space<vmem>>, %arg8: memref<128x1xf32, #tpu.memory_space<vmem>>) attributes {dimension_semantics = [#tpu.dimension_semantics<parallel>, #tpu.dimension_semantics<arbitrary>], iteration_bounds = array<i64: 1, 1>, scalar_prefetch = 0 : i64, scratch_operands = 1 : i64, tpu.core_type = #tpu.core_type<tc>, window_params = [{transform_indices = @transform_0, window_bounds = array<i64: 128, 128>}, {transform_indices = @transform_1, window_bounds = array<i64: 128, 1>}, {transform_indices = @transform_2, window_bounds = array<i64: 128, 1>}, {pipeline_mode = #tpu.pipeline_mode<synchronous>, transform_indices = @transform_3, window_bounds = array<i64: 128, 128>}, {pipeline_mode = #tpu.pipeline_mode<synchronous>, transform_indices = @transform_4, window_bounds = array<i64: 1, 128>}, {transform_indices = @transform_5, window_bounds = array<i64: 8, 128>}]} {
    %c0_i32 = arith.constant 0 : i32
    %0 = arith.cmpi eq, %arg1, %c0_i32 : i32
    %1 = arith.extui %0 : i1 to i32
    %c0_i32_0 = arith.constant 0 : i32
    %2 = arith.cmpi ne, %1, %c0_i32_0 : i32
    scf.if %2 {
      %cst_34 = arith.constant 0.000000e+00 : f32
      %85 = vector.broadcast %cst_34 : f32 to vector<128x1xf32>
      %c0_35 = arith.constant 0 : index
      %c0_36 = arith.constant 0 : index
      %86 = vector.load %arg8[%c0_35, %c0_36] : memref<128x1xf32, #tpu.memory_space<vmem>>, vector<128x1xf32>
      tpu.vector_store %arg8[%c0_35, %c0_36], %85 {strides = array<i32>} : memref<128x1xf32, #tpu.memory_space<vmem>>, vector<128x1xf32>,
    } else {
    }
    %c0 = arith.constant 0 : index
    %c0_1 = arith.constant 0 : index
    %3 = vector.load %arg2[%c0, %c0_1] : memref<128x128xf32, #tpu.memory_space<vmem>>, vector<128x128xf32>
    %c0_2 = arith.constant 0 : index
    %c0_3 = arith.constant 0 : index
    %4 = vector.load %arg5[%c0_2, %c0_3] : memref<128x128xf32, #tpu.memory_space<vmem>>, vector<128x128xf32>
    %cst = arith.constant dense<0.000000e+00> : vector<128x128xf32>
    %5 = tpu.matmul %3, %4, %cst {dimension_numbers = #tpu.dot_dimension_numbers<[1], [0], [0], [1], [0, 0, 1, 1], [], []>} : vector<128x128xf32>, vector<128x128xf32>, vector<128x128xf32> -> vector<128x128xf32>
    %c0_4 = arith.constant 0 : index
    %c0_5 = arith.constant 0 : index
    %6 = vector.load %arg4[%c0_4, %c0_5] : memref<128x1xf32, #tpu.memory_space<vmem>>, vector<128x1xf32>
    %c0_6 = arith.constant 0 : index
    %c0_7 = arith.constant 0 : index
    %7 = vector.load %arg6[%c0_6, %c0_7] : memref<1x128xf32, #tpu.memory_space<vmem>>, vector<1x128xf32>
    %8 = vector.broadcast %6 : vector<128x1xf32> to vector<128x128xf32>
    %9 = vector.broadcast %7 : vector<1x128xf32> to vector<128x128xf32>
    %10 = arith.addf %8, %9 : vector<128x128xf32>
    %cst_8 = arith.constant 2.000000e+00 : f32
    %11 = vector.broadcast %cst_8 : f32 to vector<128x128xf32>
    %12 = arith.mulf %11, %5 : vector<128x128xf32>
    %13 = arith.subf %10, %12 : vector<128x128xf32>
    %cst_9 = arith.constant 9.99999996E-13 : f32
    %14 = vector.broadcast %cst_9 : f32 to vector<128x128xf32>
    %15 = arith.maximumf %13, %14 : vector<128x128xf32>
    %16 = math.sqrt %15 : vector<128x128xf32>
    %17 = tpu.iota {dimensions = array<i32: 1>} : vector<1x128xi32>
    %c0_10 = arith.constant 0 : index
    %c0_11 = arith.constant 0 : index
    %18 = vector.load %arg3[%c0_10, %c0_11] : memref<128x1xi32, #tpu.memory_space<vmem>>, vector<128x1xi32>
    %19 = vector.broadcast %17 : vector<1x128xi32> to vector<128x128xi32>
    %20 = vector.broadcast %18 : vector<128x1xi32> to vector<128x128xi32>
    %21 = arith.cmpi eq, %19, %20 : vector<128x128xi32>
    %cst_12 = arith.constant 0.000000e+00 : f32
    %22 = vector.broadcast %cst_12 : f32 to vector<128x128xf32>
    %23 = arith.select %21, %16, %22 : vector<128x128xi1>, vector<128x128xf32>
    %cst_13 = arith.constant dense<0.000000e+00> : vector<128xf32>
    %24 = vector.multi_reduction <add>, %23, %cst_13 [1] : vector<128x128xf32> to vector<128xf32>
    %25 = vector.shape_cast %24 : vector<128xf32> to vector<128x1xf32>
    %cst_14 = arith.constant 1.800000e+01 : f32
    %26 = vector.broadcast %cst_14 : f32 to vector<128x1xf32>
    %27 = arith.cmpf olt, %25, %26 : vector<128x1xf32>
    %28 = arith.extui %27 : vector<128x1xi1> to vector<128x1xi32>
    %29 = arith.sitofp %28 : vector<128x1xi32> to vector<128x1xf32>
    %cst_15 = arith.constant -2.700000e-01 : f32
    %30 = vector.broadcast %cst_15 : f32 to vector<128x1xf32>
    %31 = arith.mulf %30, %25 : vector<128x1xf32>
    %32 = arith.mulf %29, %31 : vector<128x1xf32>
    %cst_16 = arith.constant 1.000000e+00 : f32
    %33 = vector.broadcast %cst_16 : f32 to vector<128x1xf32>
    %34 = arith.subf %33, %29 : vector<128x1xf32>
    %cst_17 = arith.constant 1.000000e+00 : f32
    %35 = vector.broadcast %cst_17 : f32 to vector<128x1xf32>
    %36 = arith.mulf %35, %25 : vector<128x1xf32>
    %cst_18 = arith.constant -1.800000e+01 : f32
    %37 = vector.broadcast %cst_18 : f32 to vector<128x1xf32>
    %38 = arith.addf %36, %37 : vector<128x1xf32>
    %39 = arith.mulf %34, %38 : vector<128x1xf32>
    %40 = arith.addf %32, %39 : vector<128x1xf32>
    %cst_19 = arith.constant 0.000000e+00 : f32
    %41 = vector.shape_cast %40 : vector<128x1xf32> to vector<128x1xf32>
    %42 = vector.broadcast %41 : vector<128x1xf32> to vector<128x128xf32>
    %43 = vector.broadcast %cst_19 : f32 to vector<128x128xf32>
    %44 = arith.select %21, %42, %43 : vector<128x128xi1>, vector<128x128xf32>
    %45 = arith.addf %16, %44 : vector<128x128xf32>
    %cst_20 = arith.constant 1.600000e+01 : f32
    %46 = vector.broadcast %cst_20 : f32 to vector<128x128xf32>
    %47 = arith.mulf %46, %45 : vector<128x128xf32>
    %cst_21 = arith.constant 0.000000e+00 : f32
    %48 = vector.broadcast %cst_21 : f32 to vector<128x128xf32>
    %49 = arith.subf %48, %47 : vector<128x128xf32>
    %c16_i32 = arith.constant 16 : i32
    %50 = vector.broadcast %c16_i32 : i32 to vector<1x128xi32>
    %51 = arith.cmpi slt, %17, %50 : vector<1x128xi32>
    %cst_22 = arith.constant -1.000000e+30 : f32
    %52 = vector.shape_cast %51 : vector<1x128xi1> to vector<1x128xi1>
    %53 = vector.broadcast %52 : vector<1x128xi1> to vector<128x128xi1>
    %54 = vector.broadcast %cst_22 : f32 to vector<128x128xf32>
    %55 = arith.select %53, %49, %54 : vector<128x128xi1>, vector<128x128xf32>
    %cst_23 = arith.constant dense<0xFF800000> : vector<128xf32>
    %56 = vector.multi_reduction <maximumf>, %55, %cst_23 [1] : vector<128x128xf32> to vector<128xf32>
    %57 = vector.shape_cast %56 : vector<128xf32> to vector<128x1xf32>
    %58 = vector.broadcast %57 : vector<128x1xf32> to vector<128x128xf32>
    %59 = arith.subf %55, %58 : vector<128x128xf32>
    %60 = math.exp %59 : vector<128x128xf32>
    %cst_24 = arith.constant dense<0.000000e+00> : vector<128xf32>
    %61 = vector.multi_reduction <add>, %60, %cst_24 [1] : vector<128x128xf32> to vector<128xf32>
    %62 = vector.shape_cast %61 : vector<128xf32> to vector<128x1xf32>
    %63 = math.log %62 : vector<128x1xf32>
    %64 = arith.addf %63, %57 : vector<128x1xf32>
    %65 = arith.addf %25, %40 : vector<128x1xf32>
    %cst_25 = arith.constant 1.600000e+01 : f32
    %66 = vector.broadcast %cst_25 : f32 to vector<128x1xf32>
    %67 = arith.mulf %66, %65 : vector<128x1xf32>
    %68 = arith.addf %67, %64 : vector<128x1xf32>
    %c1_i32 = arith.constant 1 : i32
    %69 = arith.muli %arg0, %c1_i32 : i32
    %70 = arith.addi %69, %arg1 : i32
    %c128_i32 = arith.constant 128 : i32
    %71 = arith.muli %70, %c128_i32 : i32
    %72 = tpu.iota {dimensions = array<i32: 0>} : vector<128x1xi32>
    %73 = vector.broadcast %71 : i32 to vector<128x1xi32>
    %74 = arith.addi %73, %72 : vector<128x1xi32>
    %c16_i32_26 = arith.constant 16 : i32
    %75 = vector.broadcast %c16_i32_26 : i32 to vector<128x1xi32>
    %76 = arith.cmpi slt, %74, %75 : vector<128x1xi32>
    %cst_27 = arith.constant 0.000000e+00 : f32
    %77 = vector.broadcast %cst_27 : f32 to vector<128x1xf32>
    %78 = arith.select %76, %68, %77 : vector<128x1xi1>, vector<128x1xf32>
    %c0_28 = arith.constant 0 : index
    %c0_29 = arith.constant 0 : index
    %79 = vector.load %arg8[%c0_28, %c0_29] : memref<128x1xf32, #tpu.memory_space<vmem>>, vector<128x1xf32>
    %80 = arith.addf %79, %78 : vector<128x1xf32>
    %c0_30 = arith.constant 0 : index
    %c0_31 = arith.constant 0 : index
    %81 = vector.load %arg8[%c0_30, %c0_31] : memref<128x1xf32, #tpu.memory_space<vmem>>, vector<128x1xf32>
    tpu.vector_store %arg8[%c0_30, %c0_31], %80 {strides = array<i32>} : memref<128x1xf32, #tpu.memory_space<vmem>>, vector<128x1xf32>,
    %c0_i32_32 = arith.constant 0 : i32
    %82 = arith.cmpi eq, %arg1, %c0_i32_32 : i32
    %83 = arith.extui %82 : i1 to i32
    %c0_i32_33 = arith.constant 0 : i32
    %84 = arith.cmpi ne, %83, %c0_i32_33 : i32
    scf.if %84 {
      %c0_34 = arith.constant 0 : index
      %c0_35 = arith.constant 0 : index
      %85 = vector.load %arg8[%c0_34, %c0_35] : memref<128x1xf32, #tpu.memory_space<vmem>>, vector<128x1xf32>
      %86 = vector.shape_cast %85 : vector<128x1xf32> to vector<1x128x1xf32>
      %cst_36 = arith.constant dense<0.000000e+00> : vector<1xf32>
      %87 = vector.multi_reduction <add>, %86, %cst_36 [1, 2] : vector<1x128x1xf32> to vector<1xf32>
      %88 = vector.shape_cast %87 : vector<1xf32> to vector<1x1x1xf32>
      %89 = vector.extract %88[0, 0, 0] : f32 from vector<1x1x1xf32>
      %cst_37 = arith.constant 6.250000e-02 : f32
      %90 = arith.mulf %89, %cst_37 : f32
      %91 = vector.broadcast %90 : f32 to vector<8x128xf32>
      %c0_38 = arith.constant 0 : index
      %c0_39 = arith.constant 0 : index
      %92 = vector.load %arg7[%c0_38, %c0_39] : memref<8x128xf32, #tpu.memory_space<vmem>>, vector<8x128xf32>
      tpu.vector_store %arg7[%c0_38, %c0_39], %91 {strides = array<i32>} : memref<8x128xf32, #tpu.memory_space<vmem>>, vector<8x128xf32>,
    } else {
    }
    return
  }
  func.func @transform_0(%arg0: i32, %arg1: i32) -> (i32, i32) {
    %c1_i32 = arith.constant 1 : i32
    %0 = arith.muli %arg0, %c1_i32 : i32
    %1 = arith.addi %0, %arg1 : i32
    %c0_i32 = arith.constant 0 : i32
    %c0_i32_0 = arith.constant 0 : i32
    return %1, %c0_i32 : i32, i32
  }
  func.func @transform_1(%arg0: i32, %arg1: i32) -> (i32, i32) {
    %c1_i32 = arith.constant 1 : i32
    %0 = arith.muli %arg0, %c1_i32 : i32
    %1 = arith.addi %0, %arg1 : i32
    %c0_i32 = arith.constant 0 : i32
    %c0_i32_0 = arith.constant 0 : i32
    return %1, %c0_i32 : i32, i32
  }
  func.func @transform_2(%arg0: i32, %arg1: i32) -> (i32, i32) {
    %c1_i32 = arith.constant 1 : i32
    %0 = arith.muli %arg0, %c1_i32 : i32
    %1 = arith.addi %0, %arg1 : i32
    %c0_i32 = arith.constant 0 : i32
    %c0_i32_0 = arith.constant 0 : i32
    return %1, %c0_i32 : i32, i32
  }
  func.func @transform_3(%arg0: i32, %arg1: i32) -> (i32, i32) {
    %c0_i32 = arith.constant 0 : i32
    %c0_i32_0 = arith.constant 0 : i32
    %c0_i32_1 = arith.constant 0 : i32
    return %c0_i32, %c0_i32_0 : i32, i32
  }
  func.func @transform_4(%arg0: i32, %arg1: i32) -> (i32, i32) {
    %c0_i32 = arith.constant 0 : i32
    %c0_i32_0 = arith.constant 0 : i32
    %c0_i32_1 = arith.constant 0 : i32
    return %c0_i32, %c0_i32_0 : i32, i32
  }
  func.func @transform_5(%arg0: i32, %arg1: i32) -> (i32, i32) {
    %c0_i32 = arith.constant 0 : i32
    %c0_i32_0 = arith.constant 0 : i32
    return %arg0, %c0_i32 : i32, i32
  }
}

</mosaic_0001>

<bundles_post_ra>
// kernel: tpu_custom_call.1
= control target key start
LH: loop header
LB: loop body
LE: loop exit
PB: predicated region body
PF: predicated region fallthrough
CT: control target
= control target key end

     0   :  { %v1536_v5 = vmov 0   ;;  %s1772_s0 = inlined_call_operand.vmem [shape: f32[128,128], index: 0, kind: input, shape index: {}]   ;;  %s1773_s1 = inlined_call_operand.vmem [shape: s32[128,1], index: 1, kind: input, shape index: {}]   ;;  %s1774_s2 = inlined_call_operand.vmem [shape: f32[128,1], index: 2, kind: input, shape index: {}]   ;;  %s1775_s3 = inlined_call_operand.vmem [shape: f32[128,128], index: 3, kind: input, shape index: {}]   ;;  %s1776_s4 = inlined_call_operand.vmem [shape: f32[1,128], index: 4, kind: input, shape index: {}]   ;;  %s1777_s5 = inlined_call_operand.hbm [shape: f32[8,128], index: 5, kind: output, shape index: {}]  }
   0x1   :  { %v124_v0 = vld [vmem:[%s1775_s3] sm:$0xff]  ;;  %v125_v1 = vld [vmem:[%s1775_s3 + $0x8] sm:$0xff]  ;;  %v126_v2 = vld [vmem:[%s1775_s3 + $0x10] sm:$0xff]  ;;  %1498 = vset.pattern.permute.xlu0 %v1536_v5  ;;  %1499 = vset.pattern.permute.xlu1 %v1536_v5 }
   0x2   :  { %v1445_v3 = vpack.c.bf16 %v125_v1, %v124_v0  ;;  %v127_v4 = vld [vmem:[%s1775_s3 + $0x18] sm:$0xff]  ;;  %v128_v7 = vld [vmem:[%s1775_s3 + $0x20] sm:$0xff]  ;;  %v129_v8 = vld [vmem:[%s1775_s3 + $0x28] sm:$0xff] }
   0x3   :  { %v1449_v6 = vpack.c.bf16 %v127_v4, %v126_v2  ;;  %v1453_v9 = vpack.c.bf16 %v129_v8, %v128_v7  ;;  %v130_v10 = vld [vmem:[%s1775_s3 + $0x30] sm:$0xff]  ;;  %v108_v11 = vld [vmem:[%s1772_s0] sm:$0xff]  ;;  %v131_v12 = vld [vmem:[%s1775_s3 + $0x38] sm:$0xff] }
   0x4   :  { %1446 = vmatprep.subr.bf16.mxu0 %v1445_v3  ;;  %1477 = vmatprep.subr.bf16.mxu1 %v1445_v3  ;;  %v285_v13 = vld [vmem:[%s1774_s2] sm:$0xff] }
   0x5   :  { %1448 = vmatpush3.bf16.msra.mxu0 %v1445_v3  ;;  %1485 = vmatpush3.bf16.msra.mxu1 %v1445_v3  ;;  %v566_v14 = vld [vmem:[%s1773_s1] sm:$0xff] }
   0x6   :  { %1450 = vmatprep.subr.bf16.mxu0 %v1449_v6  ;;  %1478 = vmatprep.subr.bf16.mxu1 %v1449_v6 }
   0x7   :  { %1421 = vmatprep.mubr.f32.mxu0 %v108_v11  ;;  %304 = vperm.xlu0 %1498, %v285_v13  }
   0x8   :  { %583 = vperm.xlu1 %1499, %v566_v14  }
   0x9   :  { %10 = vsyncpa [#allocation4], 0  ;;  %1452 = vmatpush3.bf16.msra.mxu0 %v1449_v6  ;;  %v286_v15 = vld [vmem:[%s1774_s2 + $0x8] sm:$0xff]  ;;  %1486 = vmatpush3.bf16.msra.mxu1 %v1449_v6  ;;  %v1457_v17 = vpack.c.bf16 %v131_v12, %v130_v10  ;;  %v132_v18 = vld [vmem:[%s1775_s3 + $0x40] sm:$0xff]  ;;  %v564_v44 = vlaneseq  ;;  %v1537_v63 = vmov 0.0   ;;  %vm91_vm9 = vcmask 7168  }
   0xa   :  { %v567_v16 = vld [vmem:[%s1773_s1 + $0x8] sm:$0xff]  ;;  %1454 = vmatprep.subr.bf16.mxu0 %v1453_v9  ;;  %1479 = vmatprep.subr.bf16.mxu1 %v1453_v9  ;;  %v134_v21 = vld [vmem:[%s1775_s3 + $0x50] sm:$0xff]  ;;  %v135_v22 = vld [vmem:[%s1775_s3 + $0x58] sm:$0xff]  ;;  %92 = vst.msk [vmem:[#allocation2] sm:$0xff] %vm91_vm9, %v1537_v63 }
   0xb   :  { %v133_v19 = vld [vmem:[%s1775_s3 + $0x48] sm:$0xff]  ;;  %309 = vperm.xlu0 %1498, %v286_v15   ;;  %v1465_v23 = vpack.c.bf16 %v135_v22, %v134_v21  ;;  %v136_v24 = vld [vmem:[%s1775_s3 + $0x60] sm:$0xff]  ;;  %v138_v27 = vld [vmem:[%s1775_s3 + $0x70] sm:$0xff]  ;;  %v565_v46 = vand.u32 127, %v564_v44  ;;  %93 = vst.msk [vmem:[#allocation2 + $0x8] sm:$0xff] %vm91_vm9, %v1537_v63 }
   0xc   :  { %586 = vperm.xlu1 %1499, %v567_v16   ;;  %v1461_v20 = vpack.c.bf16 %v133_v19, %v132_v18  ;;  %v137_v25 = vld [vmem:[%s1775_s3 + $0x68] sm:$0xff]  ;;  %v139_v28 = vld [vmem:[%s1775_s3 + $0x78] sm:$0xff]  ;;  %v1340_v32 = vld [vmem:[%s1776_s4] ss:$0 sm:$0xff]  ;;  %94 = vst.msk [vmem:[#allocation2 + $0x10] sm:$0xff] %vm91_vm9, %v1537_v63 }
   0xd   :  { %1456 = vmatpush3.bf16.msra.mxu0 %v1453_v9  ;;  %1487 = vmatpush3.bf16.msra.mxu1 %v1453_v9  ;;  %v1469_v26 = vpack.c.bf16 %v137_v25, %v136_v24  ;;  %v1473_v29 = vpack.c.bf16 %v139_v28, %v138_v27  ;;  %v109_v30 = vld [vmem:[%s1772_s0 + $0x8] sm:$0xff]  ;;  %vm902_vm8 = vcmp.lt.s32.totalorder %v565_v46, 16  ;;  %95 = vst.msk [vmem:[#allocation2 + $0x18] sm:$0xff] %vm91_vm9, %v1537_v63  ;;  %96 = vst.msk [vmem:[#allocation2 + $0x20] sm:$0xff] %vm91_vm9, %v1537_v63 }
   0xe   :  { %1458 = vmatprep.subr.bf16.mxu0 %v1457_v17  ;;  %1480 = vmatprep.subr.bf16.mxu1 %v1457_v17  ;;  %97 = vst.msk [vmem:[#allocation2 + $0x28] sm:$0xff] %vm91_vm9, %v1537_v63  ;;  %98 = vst.msk [vmem:[#allocation2 + $0x30] sm:$0xff] %vm91_vm9, %v1537_v63 }
   0xf   :  { %99 = vst.msk [vmem:[#allocation2 + $0x38] sm:$0xff] %vm91_vm9, %v1537_v63  ;;  %100 = vst.msk [vmem:[#allocation2 + $0x40] sm:$0xff] %vm91_vm9, %v1537_v63 }
  0x10   :  { %101 = vst.msk [vmem:[#allocation2 + $0x48] sm:$0xff] %vm91_vm9, %v1537_v63  ;;  %102 = vst.msk [vmem:[#allocation2 + $0x50] sm:$0xff] %vm91_vm9, %v1537_v63 }
  0x11   :  { %1460 = vmatpush3.bf16.msra.mxu0 %v1457_v17  ;;  %1488 = vmatpush3.bf16.msra.mxu1 %v1457_v17  ;;  %103 = vst.msk [vmem:[#allocation2 + $0x58] sm:$0xff] %vm91_vm9, %v1537_v63  ;;  %104 = vst.msk [vmem:[#allocation2 + $0x60] sm:$0xff] %vm91_vm9, %v1537_v63 }
  0x12   :  { %1462 = vmatprep.subr.bf16.mxu0 %v1461_v20  ;;  %1481 = vmatprep.subr.bf16.mxu1 %v1461_v20  ;;  %105 = vst.msk [vmem:[#allocation2 + $0x68] sm:$0xff] %vm91_vm9, %v1537_v63  ;;  %106 = vst.msk [vmem:[#allocation2 + $0x70] sm:$0xff] %vm91_vm9, %v1537_v63 }
  0x13   :  { %107 = vst.msk [vmem:[#allocation2 + $0x78] sm:$0xff] %vm91_vm9, %v1537_v63 }
  0x14   :  { %v1200_v44 = vld [vmem:[#allocation2 + $0x18] sm:$0xff] }
  0x15   :  { %1464 = vmatpush3.bf16.msra.mxu0 %v1461_v20  ;;  %1489 = vmatpush3.bf16.msra.mxu1 %v1461_v20  ;;  %1233 = vst.msk [vmem:[#allocation2 + $0x18] sm:$0xff] %vm91_vm9, %v1200_v44 }
  0x16   :  { %1466 = vmatprep.subr.bf16.mxu0 %v1465_v23  ;;  %1482 = vmatprep.subr.bf16.mxu1 %v1465_v23 }
  0x19   :  { %1468 = vmatpush3.bf16.msra.mxu0 %v1465_v23  ;;  %1490 = vmatpush3.bf16.msra.mxu1 %v1465_v23 }
  0x1a   :  { %1470 = vmatprep.subr.bf16.mxu0 %v1469_v26  ;;  %1483 = vmatprep.subr.bf16.mxu1 %v1469_v26 }
  0x1d   :  { %1472 = vmatpush3.bf16.msra.mxu0 %v1469_v26  ;;  %1491 = vmatpush3.bf16.msra.mxu1 %v1469_v26 }
  0x1e   :  { %1474 = vmatprep.subr.bf16.mxu0 %v1473_v29  ;;  %1484 = vmatprep.subr.bf16.mxu1 %v1473_v29 }
  0x21   :  { %1476 = vmatpush3.bf16.msra.mxu0 %v1473_v29  ;;  %1492 = vmatpush3.bf16.msra.mxu1 %v1473_v29 }
  0x24   :  { %1422 = vmatmul.mubr.f32.vlgmr.msra.gmra.mrb[0].mxu0 %v109_v30 }
  0x86   :  { %v305_v31 = vpop.permute.xlu0 %304 }
  0x87   :  { %v388_v35 = vadd.f32 %v1340_v32, %v305_v31  ;;  %v584_v45 = vpop.permute.xlu1 %583  ;;  %v116_v31 = vld [vmem:[%s1772_s0 + $0x40] sm:$0xff] }
  0x88   :  { %vm630_vm0 = vcmp.eq.s32.totalorder %v565_v46, %v584_v45  ;;  %1433 = vmatprep.mubr.f32.mxu1 %v116_v31  ;;  %v1201_v45 = vld [vmem:[#allocation2 + $0x20] sm:$0xff] }
  0x89   :  { %1234 = vst.msk [vmem:[#allocation2 + $0x20] sm:$0xff] %vm91_vm9, %v1201_v45 }
  0x8a   :  { %v310_v33 = vpop.permute.xlu0 %309 }
  0x8b   :  { %v389_v34 = vadd.f32 %v1340_v32, %v310_v33  ;;  %v587_v47 = vpop.permute.xlu1 %586  ;;  %v117_v32 = vld [vmem:[%s1772_s0 + $0x48] sm:$0xff]  ;;  %v110_v33 = vld [vmem:[%s1772_s0 + $0x10] sm:$0xff] }
  0x8c   :  { %vm631_vm1 = vcmp.eq.s32.totalorder %v565_v46, %v587_v47  ;;  %1424 = vmatprep.mubr.f32.mxu0 %v110_v33  ;;  %1434 = vmatmul.mubr.f32.vlgmr.msra.gmra.mrb[0].mxu1 %v117_v32  ;;  %v1202_v46 = vld [vmem:[#allocation2 + $0x28] sm:$0xff]  ;;  %v122_v47 = vld [vmem:[%s1772_s0 + $0x70] sm:$0xff] }
  0x8d   :  { %1235 = vst.msk [vmem:[#allocation2 + $0x28] sm:$0xff] %vm91_vm9, %v1202_v46 }
  0xf7   :  { %v1423_v36 = vpop.f32.mrb[0].mxu0 }
  0xf8   :  { %v405_v37 = vmul.f32 2.0, %v1423_v36  ;;  %v206_v38 = vpop.f32.mrb[1].mxu0  ;;  %v112_v36 = vld [vmem:[%s1772_s0 + $0x20] sm:$0xff] }
  0xf9   :  { %v404_v39 = vmul.f32 2.0, %v206_v38  ;;  %v113_v38 = vld [vmem:[%s1772_s0 + $0x28] sm:$0xff] }
  0xfa   :  { %v421_v40 = vsub.f32 %v389_v34, %v405_v37  ;;  %v118_v34 = vld [vmem:[%s1772_s0 + $0x50] sm:$0xff]  ;;  %v119_v37 = vld [vmem:[%s1772_s0 + $0x58] sm:$0xff] }
  0xfb   :  { %v420_v41 = vsub.f32 %v388_v35, %v404_v39  ;;  %v111_v35 = vld [vmem:[%s1772_s0 + $0x18] sm:$0xff]  ;;  %1436 = vmatprep.mubr.f32.mxu1 %v118_v34  ;;  %v120_v39 = vld [vmem:[%s1772_s0 + $0x60] sm:$0xff] }
  0xfc   :  { %v437_v42 = vmax.f32 %v421_v40, 1e-12  ;;  %1425 = vmatmul.mubr.f32.gmra.mrb[2].mxu0 %v111_v35  ;;  %v114_v40 = vld [vmem:[%s1772_s0 + $0x30] sm:$0xff]  ;;  %1437 = vmatmul.mubr.f32.gmra.mrb[2].mxu1 %v119_v37 }
  0xfd   :  { %v436_v43 = vmax.f32 %v420_v41, 1e-12  ;;  %1427 = vmatprep.mubr.f32.mxu0 %v112_v36  ;;  %v1199_v41 = vld [vmem:[#allocation2 + $0x10] sm:$0xff]  ;;  %1439 = vmatprep.mubr.f32.mxu1 %v120_v39 }
  0xfe   :  { %1500 = vrsqrt.f32 %v437_v42  ;;  %vm461_vm2 = vcmp.eq.f32.partialorder %v437_v42, inf  ;;  %v464_v51 = vand.u32 2147483648, %v437_v42  ;;  %vm463_vm3 = vcmp.eq.f32.partialorder %v437_v42, 0.0  ;;  %1232 = vst.msk [vmem:[#allocation2 + $0x10] sm:$0xff] %vm91_vm9, %v1199_v41 }
  0xff   :  { %1502 = vrsqrt.f32 %v436_v43  ;;  %vm454_vm4 = vcmp.eq.f32.partialorder %v436_v43, inf  ;;  %v457_v54 = vand.u32 2147483648, %v436_v43  ;;  %vm456_vm5 = vcmp.eq.f32.partialorder %v436_v43, 0.0 }
 0x100   :  { %1428 = vmatmul.mubr.f32.gmra.mrb[4].mxu0 %v113_v38 }
 0x101   :  { %1430 = vmatprep.mubr.f32.mxu0 %v114_v40 }
 0x108   :  { %v1501_v48 = vpop.eup %1500 }
 0x109   :  { %v1503_v49 = vpop.eup %1502  ;;  %v460_v50 = vmul.f32 %v1501_v48, %v437_v42  ;;  %v1203_v48 = vld [vmem:[#allocation2 + $0x30] sm:$0xff] }
 0x10a   :  { %v453_v52 = vmul.f32 %v1503_v49, %v436_v43  ;;  %v1204_v49 = vld [vmem:[#allocation2 + $0x38] sm:$0xff]  ;;  %1236 = vst.msk [vmem:[#allocation2 + $0x30] sm:$0xff] %vm91_vm9, %v1203_v48 }
 0x10b   :  { %v462_v53 = vsel %vm461_vm2, %v437_v42, %v460_v50  ;;  %v121_v42 = vld [vmem:[%s1772_s0 + $0x68] sm:$0xff]  ;;  %v1205_v50 = vld [vmem:[#allocation2 + $0x40] sm:$0xff]  ;;  %1237 = vst.msk [vmem:[#allocation2 + $0x38] sm:$0xff] %vm91_vm9, %v1204_v49 }
 0x10c   :  { %v465_v55 = vsel %vm463_vm3, %v464_v51, %v462_v53  ;;  %v455_v56 = vsel %vm454_vm4, %v436_v43, %v453_v52  ;;  %v115_v43 = vld [vmem:[%s1772_s0 + $0x38] sm:$0xff]  ;;  %v1206_v51 = vld [vmem:[#allocation2 + $0x48] sm:$0xff]  ;;  %v1207_v52 = vld [vmem:[#allocation2 + $0x50] sm:$0xff]  ;;  %1238 = vst.msk [vmem:[#allocation2 + $0x40] sm:$0xff] %vm91_vm9, %v1205_v50  ;;  %1440 = vmatmul.mubr.f32.gmra.mrb[4].mxu1 %v121_v42 }
 0x10d   :  { %v647_v57 = vsel %vm631_vm1, %v465_v55, 0.0  ;;  %v458_v58 = vsel %vm456_vm5, %v457_v54, %v455_v56  ;;  %v1208_v53 = vld [vmem:[#allocation2 + $0x58] sm:$0xff]  ;;  %v1209_v54 = vld [vmem:[#allocation2 + $0x60] sm:$0xff]  ;;  %v1211_v56 = vld [vmem:[#allocation2 + $0x70] sm:$0xff]  ;;  %1239 = vst.msk [vmem:[#allocation2 + $0x48] sm:$0xff] %vm91_vm9, %v1206_v51  ;;  %1431 = vmatmul.mubr.f32.gmra.mrb[6].mxu0 %v115_v43  ;;  %1442 = vmatprep.mubr.f32.mxu1 %v122_v47 }
 0x10e   :  { %664 = vadd.xlane.f32.xlu1 %v647_v57  ;;  %v646_v59 = vsel %vm630_vm0, %v458_v58, 0.0  ;;  %1240 = vst.msk [vmem:[#allocation2 + $0x50] sm:$0xff] %vm91_vm9, %v1207_v52  ;;  %1241 = vst.msk [vmem:[#allocation2 + $0x58] sm:$0xff] %vm91_vm9, %v1208_v53  ;;  %v1212_v57 = vld [vmem:[#allocation2 + $0x78] sm:$0xff] }
 0x10f   :  { %662 = vadd.xlane.f32.xlu0 %v646_v59  ;;  %1242 = vst.msk [vmem:[#allocation2 + $0x60] sm:$0xff] %vm91_vm9, %v1209_v54  ;;  %1244 = vst.msk [vmem:[#allocation2 + $0x70] sm:$0xff] %vm91_vm9, %v1211_v56 }
 0x110   :  { %1245 = vst.msk [vmem:[#allocation2 + $0x78] sm:$0xff] %vm91_vm9, %v1212_v57 }
 0x113   :  { %v1257_v32 = vld [vmem:[#allocation2 + $0x40] sm:$0xff] }
 0x114   :  { %v1258_v35 = vld [vmem:[#allocation2 + $0x48] sm:$0xff]  ;;  %v1280_v37 = vsel %vm91_vm9, %v1257_v32, 0.0 }
 0x115   :  { %v1259_v38 = vld [vmem:[#allocation2 + $0x50] sm:$0xff]  ;;  %v1282_v40 = vsel %vm91_vm9, %v1258_v35, 0.0  ;;  %v1260_v41 = vld [vmem:[#allocation2 + $0x58] sm:$0xff] }
 0x116   :  { %v1284_v43 = vsel %vm91_vm9, %v1259_v38, 0.0  ;;  %v1261_v44 = vld [vmem:[#allocation2 + $0x60] sm:$0xff]  ;;  %v1286_v46 = vsel %vm91_vm9, %v1260_v41, 0.0  ;;  %v1263_v50 = vld [vmem:[#allocation2 + $0x70] sm:$0xff] }
 0x117   :  { %v1288_v49 = vsel %vm91_vm9, %v1261_v44, 0.0  ;;  %v1264_v53 = vld [vmem:[#allocation2 + $0x78] sm:$0xff] }
 0x118   :  { %v1294_v57 = vsel %vm91_vm9, %v1264_v53, 0.0 }
 0x19b   :  { %v1640_v60 = vpop.xlane.xlu1 %664 }
 0x19c   :  { %vm695_vm6 = vcmp.lt.f32.partialorder %v1640_v60, 18.0  ;;  %v743_v61 = vmul.f32 -0.27, %v1640_v60  ;;  %v1644_v62 = vpop.xlane.xlu0 %662  ;;  %v791_v3 = vadd.f32 -18.0, %v1640_v60 }
 0x19d   :  { %v1342_v0 = vsel %vm695_vm6, 1.0, %v1537_v63  ;;  %vm694_vm7 = vcmp.lt.f32.partialorder %v1644_v62, 18.0  ;;  %v742_v1 = vmul.f32 -0.27, %v1644_v62  ;;  %v790_v6 = vadd.f32 -18.0, %v1644_v62 }
 0x19e   :  { %v775_v2 = vsub.f32 1.0, %v1342_v0  ;;  %v1341_v4 = vsel %vm694_vm7, 1.0, %v1537_v63  ;;  %v759_v7 = vmul.f32 %v1342_v0, %v743_v61 }
 0x19f   :  { %v774_v5 = vsub.f32 1.0, %v1341_v4  ;;  %v758_v9 = vmul.f32 %v1341_v4, %v742_v1 }
 0x1a0   :  { %v807_v8 = vmul.f32 %v791_v3, %v775_v2 }
 0x1a1   :  { %v806_v10 = vmul.f32 %v790_v6, %v774_v5  ;;  %v1197_v6 = vld [vmem:[#allocation2] sm:$0xff] }
 0x1a2   :  { %v1650_v11 = vadd.f32 %v807_v8, %v759_v7 }
 0x1a3   :  { %v1652_v12 = vadd.f32 %v806_v10, %v758_v9 }
 0x1a4   :  { %v839_v13 = vsel %vm631_vm1, %v1650_v11, 0.0  ;;  %v1082_v2 = vadd.f32 %v1650_v11, %v1640_v60  ;;  %v1251_v60 = vld [vmem:[#allocation2 + $0x10] sm:$0xff] }
 0x1a5   :  { %v838_v14 = vsel %vm630_vm0, %v1652_v12, 0.0  ;;  %v855_v15 = vadd.f32 %v839_v13, %v465_v55  ;;  %v1210_v55 = vld [vmem:[#allocation2 + $0x68] sm:$0xff]  ;;  %v1081_v63 = vadd.f32 %v1652_v12, %v1644_v62 }
 0x1a6   :  { %v854_v16 = vadd.f32 %v838_v14, %v458_v58  ;;  %1243 = vst.msk [vmem:[#allocation2 + $0x68] sm:$0xff] %vm91_vm9, %v1210_v55  ;;  %v123_v58 = vld [vmem:[%s1772_s0 + $0x78] sm:$0xff]  ;;  %v1098_v9 = vmul.f32 16.0, %v1082_v2  ;;  %v1198_v14 = vld [vmem:[#allocation2 + $0x8] sm:$0xff]  ;;  %v1292_v55 = vsel %vm91_vm9, %v1263_v50, 0.0  ;;  %s1538_s0 = smov [#allocation3]  }
 0x1a7   :  { %v871_v18 = vmul.f32 16.0, %v855_v15  ;;  %1443 = vmatmul.mubr.f32.gmra.mrb[6].mxu1 %v123_v58  ;;  %v1097_v3 = vmul.f32 16.0, %v1081_v63  ;;  %s1314_s11 = sshll.u32 %s1538_s0, 4  ;;  %s1315_s11 = int_to_ptr.vmem [resolvable:$true] %s1314_s11 }
 0x1a8   :  { %v870_v17 = vmul.f32 16.0, %v854_v16  ;;  %v1252_v16 = vld [vmem:[#allocation2 + $0x18] sm:$0xff]  ;;  %s1512_s12 = scalar_lea.vmem %s1315_s11, 128  ;;  %p1517_p1 = scmp.lt.s32.totalorder %s1315_s11, %s1315_s11 }
 0x1a9   :  { %v887_v21 = vsub.f32 0.0, %v871_v18  ;;  %p1513_p0 = scmp.ne.s32.totalorder %s1315_s11, %s1512_s12  ;;  %p1518_p2 = scmp.lt.s32.totalorder %s1512_s12, %s1512_s12 }
 0x1aa   :  { %v886_v19 = vsub.f32 0.0, %v870_v17 }
 0x1ab   :  { %v906_v22 = vsel %vm902_vm8, %v887_v21, -1e+30  ;;  %p1519_p3 = por %p1518_p2, %p1517_p1 }
 0x1ac   :  { %v905_v20 = vsel %vm902_vm8, %v886_v19, -1e+30  ;;  %v1268_v19 = vsel %vm91_vm9, %v1251_v60, 0.0 }
 0x1ad   :  { %921 = vmax.xlane.f32.xlu0 %v905_v20  ;;  %v1262_v47 = vld [vmem:[#allocation2 + $0x68] sm:$0xff]  ;;  %p1520_p4 = pnand %p1519_p3, %p1513_p0 }
 0x1ae   :  { %v1290_v52 = vsel %vm91_vm9, %v1262_v47, 0.0 }
 0x1b1   :  { %923 = vmax.xlane.f32.xlu0 %v906_v22 }
 0x1cf   :  { %v1426_v63 = vpop.f32.mrb[2].mxu0 }
 0x23a   :  { %v1658_v23 = vpop.xlane.xlu0 %921 }
 0x23b   :  { %v953_v24 = vsub.f32 %v905_v20, %v1658_v23  ;;  %v1253_v20 = vld [vmem:[#allocation2 + $0x20] sm:$0xff] }
 0x23d   :  { %v969_v25 = vmul.f32 1.442695, %v953_v24 }
 0x23e   :  { %v1661_v26 = vpop.xlane.xlu0 %923 }
 0x23f   :  { %1504 = vpow2.f32 %v969_v25  ;;  %v954_v27 = vsub.f32 %v906_v22, %v1661_v26  ;;  %v1270_v22 = vsel %vm91_vm9, %v1252_v16, 0.0  ;;  %v1272_v25 = vsel %vm91_vm9, %v1253_v20, 0.0 }
 0x241   :  { %v971_v28 = vmul.f32 1.442695, %v954_v27 }
 0x243   :  { %1506 = vpow2.f32 %v971_v28 }
 0x249   :  { %v1505_v29 = vpop.eup %1504 }
 0x24a   :  { %1001 = vadd.xlane.f32.xlu1 %v1505_v29  ;;  %v1256_v29 = vld [vmem:[#allocation2 + $0x38] sm:$0xff] }
 0x24b   :  { %v1278_v34 = vsel %vm91_vm9, %v1256_v29, 0.0 }
 0x24d   :  { %v1507_v30 = vpop.eup %1506 }
 0x24e   :  { %1003 = vadd.xlane.f32.xlu0 %v1507_v30 }
 0x2d7   :  { %v1002_v59 = vpop.xlane.xlu1 %1001 }
 0x2d8   :  { %1508 = vlog2.f32 %v1002_v59 }
 0x2db   :  { %v1004_v61 = vpop.xlane.xlu0 %1003 }
 0x2dc   :  { %1510 = vlog2.f32 %v1004_v61  ;;  %v1435_v61 = vpop.f32.mrb[0].mxu1 }
 0x2e2   :  { %v1509_v0 = vpop.eup %1508 }
 0x2e3   :  { %v1034_v1 = vmul.f32 0.6931472, %v1509_v0  ;;  %v246_v0 = vpop.f32.mrb[1].mxu1 }
 0x2e4   :  { %v1438_v2 = vpop.f32.mrb[2].mxu1 }
 0x2e5   :  { %v1065_v4 = vadd.f32 %v1034_v1, %v1658_v23  ;;  %v1254_v23 = vld [vmem:[#allocation2 + $0x28] sm:$0xff]  ;;  %v216_v1 = vpop.f32.mrb[3].mxu0 }
 0x2e6   :  { %v1511_v5 = vpop.eup %1510  ;;  %v1274_v28 = vsel %vm91_vm9, %v1254_v23, 0.0 }
 0x2e7   :  { %v1113_v7 = vadd.f32 %v1097_v3, %v1065_v4  ;;  %v1036_v8 = vmul.f32 0.6931472, %v1511_v5  ;;  %v1429_v3 = vpop.f32.mrb[4].mxu0  ;;  %v256_v4 = vpop.f32.mrb[3].mxu1 }
 0x2e8   :  { %v226_v5 = vpop.f32.mrb[5].mxu0 }
 0x2e9   :  { %v1213_v10 = vadd.f32 %v1197_v6, %v1113_v7  ;;  %v1066_v13 = vadd.f32 %v1036_v8, %v1661_v26  ;;  %v1255_v26 = vld [vmem:[#allocation2 + $0x30] sm:$0xff]  ;;  %v1441_v6 = vpop.f32.mrb[4].mxu1  ;;  %v1432_v7 = vpop.f32.mrb[6].mxu0 }
 0x2ea   :  { %v1276_v31 = vsel %vm91_vm9, %v1255_v26, 0.0  ;;  %v266_v8 = vpop.f32.mrb[5].mxu1 }
 0x2eb   :  { %1230 = vst.msk [vmem:[#allocation2] sm:$0xff] %vm91_vm9, %v1213_v10  ;;  %v1114_v62 = vadd.f32 %v1098_v9, %v1066_v13  ;;  %v236_v9 = vpop.f32.mrb[7].mxu0  ;;  %v1444_v10 = vpop.f32.mrb[6].mxu1 }
 0x2ec   :  { %v276_v13 = vpop.f32.mrb[7].mxu1 }
 0x2ed   :  { %v1214_v12 = vadd.f32 %v1198_v14, %v1114_v62 }
 0x2ef   :  { %1231 = vst.msk [vmem:[#allocation2 + $0x8] sm:$0xff] %vm91_vm9, %v1214_v12 }
 0x2f2   :  { %v1249_v15 = vld [vmem:[#allocation2] sm:$0xff] }
 0x2f3   :  { %v1265_v17 = vsel %vm91_vm9, %v1249_v15, 0.0 }
 0x2f6   :  { %v1250_v11 = vld [vmem:[#allocation2 + $0x8] sm:$0xff] }
 0x2f7   :  { %v1266_v18 = vsel %vm91_vm9, %v1250_v11, 0.0 }
 0x2f8   :  { %v1267_v21 = vadd.f32 %v1266_v18, %v1265_v17 }
 0x2fa   :  { %v1269_v24 = vadd.f32 %v1268_v19, %v1267_v21 }
 0x2fc   :  { %v1271_v27 = vadd.f32 %v1270_v22, %v1269_v24 }
 0x2fe   :  { %v1273_v30 = vadd.f32 %v1272_v25, %v1271_v27 }
 0x300   :  { %v1275_v33 = vadd.f32 %v1274_v28, %v1273_v30 }
 0x302   :  { %v1277_v36 = vadd.f32 %v1276_v31, %v1275_v33 }
 0x304   :  { %v1279_v39 = vadd.f32 %v1278_v34, %v1277_v36 }
 0x306   :  { %v1281_v42 = vadd.f32 %v1280_v37, %v1279_v39 }
 0x308   :  { %v1283_v45 = vadd.f32 %v1282_v40, %v1281_v42 }
 0x30a   :  { %v1285_v48 = vadd.f32 %v1284_v43, %v1283_v45 }
 0x30c   :  { %v1287_v51 = vadd.f32 %v1286_v46, %v1285_v48 }
 0x30e   :  { %v1289_v54 = vadd.f32 %v1288_v49, %v1287_v51 }
 0x310   :  { %v1291_v56 = vadd.f32 %v1290_v52, %v1289_v54 }
 0x312   :  { %v1293_v58 = vadd.f32 %v1292_v55, %v1291_v56 }
 0x314   :  { %v1295_v59 = vadd.f32 %v1294_v57, %v1293_v58 }
 0x316   :  { %1296 = vadd.xlane.f32.xlu1 %v1295_v59 }
 0x3a3   :  { %v1297_v14 = vpop.xlane.xlu1 %1296 }
 0x3a4   :  { %v1298_v62 = vrot.slane %v1297_v14, 4 }
 0x3a6   :  { %v1299_v12 = vadd.f32 %v1298_v62, %v1297_v14 }
 0x3a8   :  { %v1300_v15 = vrot.slane %v1299_v12, 2 }
 0x3aa   :  { %v1301_v60 = vadd.f32 %v1300_v15, %v1299_v12 }
 0x3ac   :  { %v1302_v11 = vrot.slane %v1301_v60, 1 }
 0x3ae   :  { %v1303_v16 = vadd.f32 %v1302_v11, %v1301_v60 }
 0x3b0   :  { %1493 = vpush %v1303_v16 }
 0x3e1   :  { %s1494_s3 = spop %1493 }
 0x3e2   :  { %s1305_s4 = smul.f32 0.0625, %s1494_s3 }
 0x3e4   :  { %v1306_v17 = vstv %s1305_s4 }
 0x3e5   :  { %1307 = vst [vmem:[#allocation3] sm:$0xff] %v1306_v17 }
 0x3e6   :  { %1523 = shalt.err (!%p1520_p4)
}
 0x3e7   :  { %s1524_s15 = scalar_lea.hbm %s1777_s5, 128 }
 0x3e8   :  { %p1525_p5 = scmp.ne.s32.totalorder %s1777_s5, %s1524_s15  ;;  %p1528_p6 = scmp.lt.u32.totalorder %s1524_s15, %s1777_s5 }
 0x3ea   :  { %p1530_p7 = pnand %p1528_p6, %p1525_p5 }
 0x3ec   :  { %1533 = shalt.err (!%p1530_p7)
}
 0x3ed   :  { %1317 = dma.vmem_to_hbm [thread:$0]  %s1315_s11, 128, %s1777_s5, [#allocation4]  }
 0x3ee   :  { %1534 = dma.done.wait [#allocation4], 128  }
 0x3ef   :  { %1535 = vsyncadd [#allocation4], 4294967168 }
 0x3f0   :  { %1321 = vsyncpa [#allocation4], 1 }

</bundles_post_ra>
